<compile_context>
chip_gen: v6e
topology: v6e:2x2x1
jax: 0.10.0
libtpu: 0.0.40
codegen_flags: <defaults>
</compile_context>

<pallas_src>
import jax
import jax.numpy as jnp
from jax.experimental import pallas as pl
from jax.experimental.pallas import tpu as pltpu


def rga_layer_kernel(x_ref,          # (Bt, C, HW) bf16
                     wtpg_ref,       # (3*ic, C)   bf16  fused theta/phi/gx 1x1 convs (+BN)
                     wggt_ref,       # (2*HW, is_) bf16  gg_spatial, pre-transposed, [in ; out]
                     wspack_ref,     # (ns_d+1, is_) bf16  [ws1_r ; ws2 (zero-padded)]
                     bias_ref,       # (3*ic+is_+2*ns_d+1, 1) f32  packed biases
                     wfct_ref,       # (C, 4) f32  score head weight (BN + 1/HW folded), pre-T
                     bfc_ref,        # (1, 4) f32
                     mask_ref,       # (Bt, C, HW) bf16
                     score_ref):     # (Bt, 4)     f32
    bt, c, hw = x_ref.shape
    ic = wtpg_ref.shape[0] // 3
    is_ = wggt_ref.shape[1]
    ns_d = wspack_ref.shape[0] - 1

    x_bf = x_ref[...]                                  # (Bt, C, HW) bf16
    x_f32 = x_bf.astype(jnp.float32)

    # ---- unpack consolidated weights (static slices, no runtime cost worth noting) ----
    w_tpg = wtpg_ref[...]                              # (3ic, C) bf16
    wggin_t = wggt_ref[:hw, :]                         # (HW, is_) bf16
    wggout_t = wggt_ref[hw:, :]                        # (HW, is_) bf16
    ws1_r = wspack_ref[:ns_d, :]                       # (ns_d, is_) bf16
    ws2 = wspack_ref[ns_d:, :ns_d]                     # (1, ns_d)   bf16

    biases = bias_ref[...]                             # (?, 1) f32
    o = 0
    b_tpg = biases[o:o + 3 * ic]; o += 3 * ic          # (3ic, 1)
    bgg = biases[o:o + is_]; o += is_                  # (is_, 1)
    ws1_g = biases[o:o + ns_d]; o += ns_d              # (ns_d, 1)
    bs1 = biases[o:o + ns_d]; o += ns_d                # (ns_d, 1)
    bs2 = biases[o:o + 1]                              # (1, 1)

    # ---- fused theta / phi / gx projections: 1x1 conv (+ folded eval BN) + ReLU ----
    w_tpg_b = jnp.broadcast_to(w_tpg, (bt, 3 * ic, c))
    proj = jnp.einsum('bok,bkp->bop', w_tpg_b, x_bf,
                      preferred_element_type=jnp.float32)          # (Bt, 3ic, HW)
    proj = jnp.maximum(proj + b_tpg, 0.0)
    theta = proj[:, 0 * ic:1 * ic]                     # (Bt, ic, HW)
    phi = proj[:, 1 * ic:2 * ic]
    g_x = proj[:, 2 * ic:3 * ic]
    theta_bf = theta.astype(jnp.bfloat16)
    phi_bf = phi.astype(jnp.bfloat16)

    # ---- re-associated pairwise-relation path (HW x HW matrix never built) ----
    #   gs[p,q] = <theta[:,p], phi[:,q]>
    #   Gs_in  contribution = (phi @ wggin_t)^T  @ theta
    #   Gs_out contribution = (theta @ wggout_t)^T @ phi
    wggin_tb = jnp.broadcast_to(wggin_t, (bt, hw, is_))
    wggout_tb = jnp.broadcast_to(wggout_t, (bt, hw, is_))
    a_in = jnp.einsum('biq,bqo->boi', phi_bf, wggin_tb,
                      preferred_element_type=jnp.float32)          # (Bt, is_, ic)
    a_out = jnp.einsum('biq,bqo->boi', theta_bf, wggout_tb,
                       preferred_element_type=jnp.float32)         # (Bt, is_, ic)
    gs_joint = (jnp.einsum('boi,biq->boq', a_in.astype(jnp.bfloat16), theta_bf,
                           preferred_element_type=jnp.float32)
                + jnp.einsum('boi,biq->boq', a_out.astype(jnp.bfloat16), phi_bf,
                             preferred_element_type=jnp.float32)
                + bgg)
    gs_joint = jnp.maximum(gs_joint, 0.0)              # (Bt, is_, HW)

    # gx_spatial mean over its channels -> lane-dense (Bt, 1, HW)
    g_xs = jnp.mean(g_x, axis=1, keepdims=True)

    # ---- W_spatial: conv-BN-ReLU-conv-BN; concat([g_xs, gs_joint]) done via split weight ----
    ws1_rb = jnp.broadcast_to(ws1_r, (bt, ns_d, is_))
    h1 = (jnp.einsum('bor,brq->boq', ws1_rb, gs_joint.astype(jnp.bfloat16),
                     preferred_element_type=jnp.float32)
          + ws1_g * g_xs + bs1)
    h1 = jnp.maximum(h1, 0.0)                          # (Bt, ns_d, HW)
    ws2_b = jnp.broadcast_to(ws2, (bt, 1, ns_d))
    w_ys = jnp.einsum('bor,brq->boq', ws2_b, h1.astype(jnp.bfloat16),
                      preferred_element_type=jnp.float32) + bs2
    sig = jax.nn.sigmoid(w_ys)                         # (Bt, 1, HW)

    # RGA_Module(use_spatial): out = sigmoid(W_ys).expand_as(x) * x
    mask = sig * x_f32                                 # (Bt, C, HW) f32
    mask_ref[...] = mask.astype(mask_ref.dtype)        # bf16 write (halves HBM traffic)

    # score head: avg_pool2d(x * mask) -> score_bn -> score_fc (BN + 1/HW folded into wfc)
    pooled = jnp.sum(mask * x_f32, axis=-1)            # (Bt, C)
    score_ref[...] = (jnp.dot(pooled, wfct_ref[...],
                              preferred_element_type=jnp.float32)
                      + bfc_ref[...])                  # (Bt, 4)


def _fold_conv_bn(w, gamma, beta, mean, var, eps=1e-5):
    """Fold eval-mode BatchNorm following a bias-free 1x1 conv into (weight, bias)."""
    scale = gamma / jnp.sqrt(var + eps)
    return w * scale[:, None], (beta - mean * scale)


def make_params(channel, hw, cha_ratio=8, spa_ratio=8, down_ratio=8, eps=1e-5):
    in_spatial = (256 // 16) * (128 // 16)      # 128, hard-coded in RGA_LAYER.__init__
    assert hw == in_spatial, "RGA_LAYER hard-codes in_spatial=128 -> feature map must be 16x8"
    ic = channel // cha_ratio
    is_ = in_spatial // spa_ratio
    ns = 1 + is_
    ns_d = max(1, ns // down_ratio)
    assert ns_d <= is_

    key = jax.random.PRNGKey(0)
    ks = jax.random.split(key, 8)

    def conv_w(k, o, i):
        return 0.1 * jax.random.normal(k, (o, i), dtype=jnp.float32)

    def bn(n):   # PyTorch defaults: gamma=1, beta=0, running_mean=0, running_var=1
        return (jnp.ones((n,), jnp.float32), jnp.zeros((n,), jnp.float32),
                jnp.zeros((n,), jnp.float32), jnp.ones((n,), jnp.float32))

    # theta / phi / gx : Conv2d(channel -> ic, 1x1, bias=False) + BN + ReLU -> fused weight
    wt, bt_ = _fold_conv_bn(conv_w(ks[0], ic, channel), *bn(ic), eps=eps)
    wp, bp = _fold_conv_bn(conv_w(ks[1], ic, channel), *bn(ic), eps=eps)
    wgx, bgx = _fold_conv_bn(conv_w(ks[2], ic, channel), *bn(ic), eps=eps)
    w_tpg = jnp.concatenate([wt, wp, wgx], axis=0)                       # (3*ic, C)
    b_tpg = jnp.concatenate([bt_, bp, bgx], axis=0)                      # (3*ic,)

    # gg_spatial : Conv2d(2*in_spatial -> is_, 1x1, bias=False) + BN + ReLU
    wgg = conv_w(ks[3], is_, 2 * in_spatial)
    g_g, g_b, g_m, g_v = bn(is_)
    g_scale = g_g / jnp.sqrt(g_v + eps)
    wgg_in = wgg[:, :in_spatial] * g_scale[:, None]                      # (is_, HW)
    wgg_out = wgg[:, in_spatial:] * g_scale[:, None]                     # (is_, HW)
    bgg = g_b - g_m * g_scale                                            # (is_,)

    # W_spatial : Conv(ns -> ns_d) + BN + ReLU + Conv(ns_d -> 1) + BN
    ws1, bs1 = _fold_conv_bn(conv_w(ks[4], ns_d, ns), *bn(ns_d), eps=eps)
    ws2, bs2 = _fold_conv_bn(conv_w(ks[5], 1, ns_d), *bn(1), eps=eps)
    ws1_g = ws1[:, 0]                                                    # (ns_d,)
    ws1_r = ws1[:, 1:]                                                   # (ns_d, is_)

    # score head: BatchNorm1d(channel) folded into Linear(channel, 4); 1/HW of pool folded too
    wfc = 0.001 * jax.random.normal(ks[6], (4, channel), dtype=jnp.float32)
    bfc = jnp.zeros((4,), jnp.float32)
    s_g, s_b, s_m, s_v = bn(channel)
    s_scale = s_g / jnp.sqrt(s_v + eps)
    s_shift = s_b - s_m * s_scale
    wfc_f = (wfc * s_scale[None, :]) / float(hw)                         # (4, C)
    bfc_f = (wfc @ s_shift + bfc)[None, :]                               # (1, 4)

    # --- consolidated kernel inputs (review: fewer BlockSpecs / DMA descriptors) ---
    wgg_t = jnp.concatenate([wgg_in.T, wgg_out.T], axis=0)               # (2*HW, is_)
    ws2_pad = jnp.pad(ws2, ((0, 0), (0, is_ - ns_d)))
    ws_pack = jnp.concatenate([ws1_r, ws2_pad], axis=0)                  # (ns_d+1, is_)
    bias_pack = jnp.concatenate([b_tpg, bgg, ws1_g, bs1, bs2])[:, None]  # (3ic+is_+2ns_d+1, 1)

    return dict(
        # kernel (packed) weights
        w_tpg=w_tpg.astype(jnp.bfloat16),
        wgg_t=wgg_t.astype(jnp.bfloat16),
        ws_pack=ws_pack.astype(jnp.bfloat16),
        bias_pack=bias_pack,
        wfc_t=wfc_f.T,                                                   # (C, 4) f32
        bfc=bfc_f,                                                       # (1, 4) f32
        # f32 reference weights (un-reassociated formulation)
        ref=dict(w_tpg=w_tpg, b_tpg=b_tpg[:, None],
                 wgg_in=wgg_in, wgg_out=wgg_out, bgg=bgg[:, None],
                 ws1=ws1, bs1=bs1[:, None], ws2=ws2, bs2=bs2[:, None],
                 wfc=wfc_f, bfc=bfc_f),
        ic=ic, is_=is_, ns_d=ns_d)


def _pick_batch_tile(b):
    # Amortize ~0.35 us per-grid-step overhead, but keep >= 2 grid steps whenever B >= 2 so
    # dimension_semantics=("parallel",) shards steps across both v7x TensorCores.
    return min(8, max(1, b // 2)) if b > 1 else 1


def rga_layer(x_nchw, params, batch_tile=None):
    b, c, h, w = x_nchw.shape
    hw = h * w
    # accept / cast to the model activation dtype (bf16): halves the HBM read
    x = x_nchw.reshape(b, c, hw).astype(jnp.bfloat16)    # NCHW -> (B, C, HW): reshape only

    bt = _pick_batch_tile(b) if batch_tile is None else batch_tile
    n_tiles = pl.cdiv(b, bt)
    b_pad = n_tiles * bt
    if b_pad != b:
        x = jnp.pad(x, ((0, b_pad - b), (0, 0), (0, 0)))

    weights = (params['w_tpg'], params['wgg_t'], params['ws_pack'],
               params['bias_pack'], params['wfc_t'], params['bfc'])

    def full_spec(a):
        # full-array block, constant index map -> fetched once, reused across grid steps
        return pl.BlockSpec(a.shape, lambda i: (0,) * a.ndim)

    in_specs = ([pl.BlockSpec((bt, c, hw), lambda i: (i, 0, 0))]
                + [full_spec(wt) for wt in weights])

    out_specs = (pl.BlockSpec((bt, c, hw), lambda i: (i, 0, 0)),
                 pl.BlockSpec((None, bt, 4), lambda i: (i, 0, 0)))

    mask_flat, score3 = pl.pallas_call(
        rga_layer_kernel,
        out_shape=(jax.ShapeDtypeStruct((b_pad, c, hw), jnp.bfloat16),
                   jax.ShapeDtypeStruct((n_tiles, bt, 4), jnp.float32)),
        grid=(n_tiles,),
        in_specs=in_specs,
        out_specs=out_specs,
        compiler_params=pltpu.CompilerParams(
            dimension_semantics=("parallel",),
            vmem_limit_bytes=8 << 20),
    )(x, *weights)

    mask = mask_flat[:b].reshape(b, c, h, w)             # already NCHW order (bf16)
    score = score3.reshape(b_pad, 4)[:b]
    return mask, score


def rga_layer_reference(x_nchw, params):
    """Pure-JAX f32 reference using the original (un-reassociated) formulation."""
    r = params['ref']
    b, c, h, w = x_nchw.shape
    hw = h * w
    ic = params['ic']
    x = x_nchw.reshape(b, c, hw).astype(jnp.float32)
    proj = jnp.maximum(jnp.einsum('oc,bcp->bop', r['w_tpg'], x) + r['b_tpg'][None], 0.0)
    theta, phi, g_x = proj[:, :ic], proj[:, ic:2 * ic], proj[:, 2 * ic:]
    gs = jnp.einsum('bip,biq->bpq', theta, phi)                          # (B, HW, HW)
    gs_joint = jnp.maximum(jnp.einsum('bpq,oq->bop', gs, r['wgg_in'])
                           + jnp.einsum('bqp,oq->bop', gs, r['wgg_out'])
                           + r['bgg'][None], 0.0)                        # (B, is_, HW)
    g_xs = jnp.mean(g_x, axis=1, keepdims=True)                          # (B, 1, HW)
    ys = jnp.concatenate([g_xs, gs_joint], axis=1)                       # (B, 1+is_, HW)
    h1 = jnp.maximum(jnp.einsum('on,bnp->bop', r['ws1'], ys) + r['bs1'][None], 0.0)
    w_ys = jnp.einsum('on,bnp->bop', r['ws2'], h1) + r['bs2'][None]
    sig = jax.nn.sigmoid(w_ys)
    mask = sig * x
    pooled = jnp.sum(mask * x, axis=-1)                                  # (B, C)
    score = pooled @ r['wfc'].T + r['bfc']                               # (B, 4)
    return mask.reshape(b, c, h, w), score


if __name__ == "__main__":
    B, C, H, W = 2, 32, 16, 8           # H*W must equal 128 (in_spatial baked into gg_spatial)
    params = make_params(C, H * W)

    x = jax.random.normal(jax.random.PRNGKey(0), (B, C, H, W), dtype=jnp.float32)
    x = x.astype(jnp.bfloat16)          # model activation dtype

    mask, score = jax.jit(lambda a: rga_layer(a, params))(x)
    jax.block_until_ready((mask, score))

    assert mask.shape == (B, C, H, W) and score.shape == (B, 4)
    mask_f = mask.astype(jnp.float32)
    assert jnp.isfinite(mask_f).all() and jnp.isfinite(score).all()

    # cross-check the batched/re-associated bf16 kernel against the naive f32 reference
    mask_ref, score_ref = rga_layer_reference(x, params)
    assert jnp.allclose(mask_f, mask_ref, atol=3e-2, rtol=3e-2), \
        float(jnp.max(jnp.abs(mask_f - mask_ref)))
    assert jnp.allclose(score, score_ref, atol=3e-2, rtol=3e-2), \
        float(jnp.max(jnp.abs(score - score_ref)))

    print("KERNEL_OK")
</pallas_src>

<mosaic_0001>
module attributes {stable_mosaic.version = 11 : i64} {
  func.func @rga_layer_kernel(%arg0: i32, %arg1: memref<1x32x128xbf16, #tpu.memory_space<vmem>>, %arg2: memref<12x32xbf16, #tpu.memory_space<vmem>>, %arg3: memref<256x16xbf16, #tpu.memory_space<vmem>>, %arg4: memref<3x16xbf16, #tpu.memory_space<vmem>>, %arg5: memref<33x1xf32, #tpu.memory_space<vmem>>, %arg6: memref<32x4xf32, #tpu.memory_space<vmem>>, %arg7: memref<1x4xf32, #tpu.memory_space<vmem>>, %arg8: memref<1x32x128xbf16, #tpu.memory_space<vmem>>, %arg9: memref<1x1x4xf32, #tpu.memory_space<vmem>>) attributes {dimension_semantics = [#tpu.dimension_semantics<parallel>], iteration_bounds = array<i64: 2>, scalar_prefetch = 0 : i64, scratch_operands = 0 : i64, tpu.core_type = #tpu.core_type<tc>, window_params = [{transform_indices = @transform_0, window_bounds = array<i64: 1, 32, 128>}, {pipeline_mode = #tpu.pipeline_mode<synchronous>, transform_indices = @transform_1, window_bounds = array<i64: 12, 32>}, {pipeline_mode = #tpu.pipeline_mode<synchronous>, transform_indices = @transform_2, window_bounds = array<i64: 256, 16>}, {pipeline_mode = #tpu.pipeline_mode<synchronous>, transform_indices = @transform_3, window_bounds = array<i64: 3, 16>}, {pipeline_mode = #tpu.pipeline_mode<synchronous>, transform_indices = @transform_4, window_bounds = array<i64: 33, 1>}, {pipeline_mode = #tpu.pipeline_mode<synchronous>, transform_indices = @transform_5, window_bounds = array<i64: 32, 4>}, {pipeline_mode = #tpu.pipeline_mode<synchronous>, transform_indices = @transform_6, window_bounds = array<i64: 1, 4>}, {transform_indices = @transform_7, window_bounds = array<i64: 1, 32, 128>}, {transform_indices = @transform_8, window_bounds = array<i64: 1, 1, 4>}]} {
    %c0 = arith.constant 0 : index
    %c0_0 = arith.constant 0 : index
    %c0_1 = arith.constant 0 : index
    %0 = vector.load %arg1[%c0, %c0_0, %c0_1] : memref<1x32x128xbf16, #tpu.memory_space<vmem>>, vector<1x32x128xbf16>
    %1 = arith.extf %0 : vector<1x32x128xbf16> to vector<1x32x128xf32>
    %c0_2 = arith.constant 0 : index
    %c0_3 = arith.constant 0 : index
    %2 = vector.load %arg2[%c0_2, %c0_3] : memref<12x32xbf16, #tpu.memory_space<vmem>>, vector<12x32xbf16>
    %c0_4 = arith.constant 0 : index
    %c0_5 = arith.constant 0 : index
    %3 = vector.load %arg3[%c0_4, %c0_5] : memref<256x16xbf16, #tpu.memory_space<vmem>>, vector<128x16xbf16>
    %c128 = arith.constant 128 : index
    %c0_6 = arith.constant 0 : index
    %4 = vector.load %arg3[%c128, %c0_6] : memref<256x16xbf16, #tpu.memory_space<vmem>>, vector<128x16xbf16>
    %c0_7 = arith.constant 0 : index
    %c0_8 = arith.constant 0 : index
    %5 = vector.load %arg4[%c0_7, %c0_8] : memref<3x16xbf16, #tpu.memory_space<vmem>>, vector<2x16xbf16>
    %c2 = arith.constant 2 : index
    %c0_9 = arith.constant 0 : index
    %6 = vector.load %arg4[%c2, %c0_9] : memref<3x16xbf16, #tpu.memory_space<vmem>>, vector<1x2xbf16>
    %c0_10 = arith.constant 0 : index
    %c0_11 = arith.constant 0 : index
    %7 = vector.load %arg5[%c0_10, %c0_11] : memref<33x1xf32, #tpu.memory_space<vmem>>, vector<33x1xf32>
    %8 = vector.extract_strided_slice %7 {offsets = [0, 0], sizes = [12, 1], strides = [1, 1]} : vector<33x1xf32> to vector<12x1xf32>
    %9 = vector.extract_strided_slice %7 {offsets = [12, 0], sizes = [16, 1], strides = [1, 1]} : vector<33x1xf32> to vector<16x1xf32>
    %10 = vector.extract_strided_slice %7 {offsets = [28, 0], sizes = [2, 1], strides = [1, 1]} : vector<33x1xf32> to vector<2x1xf32>
    %11 = vector.extract_strided_slice %7 {offsets = [30, 0], sizes = [2, 1], strides = [1, 1]} : vector<33x1xf32> to vector<2x1xf32>
    %12 = vector.extract_strided_slice %7 {offsets = [32, 0], sizes = [1, 1], strides = [1, 1]} : vector<33x1xf32> to vector<1x1xf32>
    %13 = vector.shape_cast %2 : vector<12x32xbf16> to vector<1x12x32xbf16>
    "tpu.trace_start"() <{level = 10 : i32, message = "bok,bkp->bop"}> : () -> ()
    %cst = arith.constant dense<0.000000e+00> : vector<1x12x128xf32>
    %14 = tpu.matmul %13, %0, %cst {dimension_numbers = #tpu.dot_dimension_numbers<[2], [1], [1], [2], [0, 0, 0, 1, 1, 2], [0], [0]>} : vector<1x12x32xbf16>, vector<1x32x128xbf16>, vector<1x12x128xf32> -> vector<1x12x128xf32>
    "tpu.trace_stop"() : () -> ()
    %15 = vector.shape_cast %8 : vector<12x1xf32> to vector<1x12x1xf32>
    %16 = vector.broadcast %15 : vector<1x12x1xf32> to vector<1x12x128xf32>
    %17 = arith.addf %14, %16 : vector<1x12x128xf32>
    %cst_12 = arith.constant 0.000000e+00 : f32
    %18 = vector.broadcast %cst_12 : f32 to vector<1x12x128xf32>
    %19 = arith.maximumf %17, %18 : vector<1x12x128xf32>
    %20 = vector.extract_strided_slice %19 {offsets = [0, 0, 0], sizes = [1, 4, 128], strides = [1, 1, 1]} : vector<1x12x128xf32> to vector<1x4x128xf32>
    %21 = vector.extract_strided_slice %19 {offsets = [0, 4, 0], sizes = [1, 4, 128], strides = [1, 1, 1]} : vector<1x12x128xf32> to vector<1x4x128xf32>
    %22 = vector.extract_strided_slice %19 {offsets = [0, 8, 0], sizes = [1, 4, 128], strides = [1, 1, 1]} : vector<1x12x128xf32> to vector<1x4x128xf32>
    %23 = arith.truncf %20 : vector<1x4x128xf32> to vector<1x4x128xbf16>
    %24 = arith.truncf %21 : vector<1x4x128xf32> to vector<1x4x128xbf16>
    %25 = vector.shape_cast %3 : vector<128x16xbf16> to vector<1x128x16xbf16>
    %26 = vector.shape_cast %4 : vector<128x16xbf16> to vector<1x128x16xbf16>
    "tpu.trace_start"() <{level = 10 : i32, message = "biq,bqo->boi"}> : () -> ()
    %cst_13 = arith.constant dense<0.000000e+00> : vector<1x16x4xf32>
    %27 = tpu.matmul %25, %24, %cst_13 {dimension_numbers = #tpu.dot_dimension_numbers<[1], [2], [2], [1], [0, 0, 0, 2, 1, 1], [0], [0]>} : vector<1x128x16xbf16>, vector<1x4x128xbf16>, vector<1x16x4xf32> -> vector<1x16x4xf32>
    %cst_14 = arith.constant dense<0.000000e+00> : vector<1x16x4xf32>
    %28 = tpu.matmul %26, %23, %cst_14 {dimension_numbers = #tpu.dot_dimension_numbers<[1], [2], [2], [1], [0, 0, 0, 2, 1, 1], [0], [0]>} : vector<1x128x16xbf16>, vector<1x4x128xbf16>, vector<1x16x4xf32> -> vector<1x16x4xf32>
    "tpu.trace_stop"() : () -> ()
    %29 = arith.truncf %27 : vector<1x16x4xf32> to vector<1x16x4xbf16>
    "tpu.trace_start"() <{level = 10 : i32, message = "boi,biq->boq"}> : () -> ()
    %cst_15 = arith.constant dense<0.000000e+00> : vector<1x16x128xf32>
    %30 = tpu.matmul %29, %23, %cst_15 {dimension_numbers = #tpu.dot_dimension_numbers<[2], [1], [1], [2], [0, 0, 0, 1, 1, 2], [0], [0]>} : vector<1x16x4xbf16>, vector<1x4x128xbf16>, vector<1x16x128xf32> -> vector<1x16x128xf32>
    "tpu.trace_stop"() : () -> ()
    %31 = arith.truncf %28 : vector<1x16x4xf32> to vector<1x16x4xbf16>
    "tpu.trace_start"() <{level = 10 : i32, message = "boi,biq->boq"}> : () -> ()
    %cst_16 = arith.constant dense<0.000000e+00> : vector<1x16x128xf32>
    %32 = tpu.matmul %31, %24, %cst_16 {dimension_numbers = #tpu.dot_dimension_numbers<[2], [1], [1], [2], [0, 0, 0, 1, 1, 2], [0], [0]>} : vector<1x16x4xbf16>, vector<1x4x128xbf16>, vector<1x16x128xf32> -> vector<1x16x128xf32>
    "tpu.trace_stop"() : () -> ()
    %33 = arith.addf %30, %32 : vector<1x16x128xf32>
    %34 = vector.shape_cast %9 : vector<16x1xf32> to vector<1x16x1xf32>
    %35 = vector.broadcast %34 : vector<1x16x1xf32> to vector<1x16x128xf32>
    %36 = arith.addf %33, %35 : vector<1x16x128xf32>
    %cst_17 = arith.constant 0.000000e+00 : f32
    %37 = vector.broadcast %cst_17 : f32 to vector<1x16x128xf32>
    %38 = arith.maximumf %36, %37 : vector<1x16x128xf32>
    %cst_18 = arith.constant dense<0.000000e+00> : vector<1x128xf32>
    %39 = vector.multi_reduction <add>, %22, %cst_18 [1] : vector<1x4x128xf32> to vector<1x128xf32>
    %40 = vector.shape_cast %39 : vector<1x128xf32> to vector<1x1x128xf32>
    %cst_19 = arith.constant 4.000000e+00 : f32
    %41 = vector.broadcast %cst_19 : f32 to vector<1x1x128xf32>
    %42 = arith.divf %40, %41 : vector<1x1x128xf32>
    %43 = vector.shape_cast %5 : vector<2x16xbf16> to vector<1x2x16xbf16>
    %44 = arith.truncf %38 : vector<1x16x128xf32> to vector<1x16x128xbf16>
    "tpu.trace_start"() <{level = 10 : i32, message = "bor,brq->boq"}> : () -> ()
    %cst_20 = arith.constant dense<0.000000e+00> : vector<1x2x128xf32>
    %45 = tpu.matmul %43, %44, %cst_20 {dimension_numbers = #tpu.dot_dimension_numbers<[2], [1], [1], [2], [0, 0, 0, 1, 1, 2], [0], [0]>} : vector<1x2x16xbf16>, vector<1x16x128xbf16>, vector<1x2x128xf32> -> vector<1x2x128xf32>
    "tpu.trace_stop"() : () -> ()
    %46 = vector.shape_cast %10 : vector<2x1xf32> to vector<1x2x1xf32>
    %47 = vector.broadcast %46 : vector<1x2x1xf32> to vector<1x2x128xf32>
    %48 = vector.broadcast %42 : vector<1x1x128xf32> to vector<1x2x128xf32>
    %49 = arith.mulf %47, %48 : vector<1x2x128xf32>
    %50 = arith.addf %45, %49 : vector<1x2x128xf32>
    %51 = vector.shape_cast %11 : vector<2x1xf32> to vector<1x2x1xf32>
    %52 = vector.broadcast %51 : vector<1x2x1xf32> to vector<1x2x128xf32>
    %53 = arith.addf %50, %52 : vector<1x2x128xf32>
    %cst_21 = arith.constant 0.000000e+00 : f32
    %54 = vector.broadcast %cst_21 : f32 to vector<1x2x128xf32>
    %55 = arith.maximumf %53, %54 : vector<1x2x128xf32>
    %56 = vector.shape_cast %6 : vector<1x2xbf16> to vector<1x1x2xbf16>
    %57 = arith.truncf %55 : vector<1x2x128xf32> to vector<1x2x128xbf16>
    "tpu.trace_start"() <{level = 10 : i32, message = "bor,brq->boq"}> : () -> ()
    %cst_22 = arith.constant dense<0.000000e+00> : vector<1x1x128xf32>
    %58 = tpu.matmul %56, %57, %cst_22 {dimension_numbers = #tpu.dot_dimension_numbers<[2], [1], [1], [2], [0, 0, 0, 1, 1, 2], [0], [0]>} : vector<1x1x2xbf16>, vector<1x2x128xbf16>, vector<1x1x128xf32> -> vector<1x1x128xf32>
    "tpu.trace_stop"() : () -> ()
    %59 = vector.shape_cast %12 : vector<1x1xf32> to vector<1x1x1xf32>
    %60 = vector.broadcast %59 : vector<1x1x1xf32> to vector<1x1x128xf32>
    %61 = arith.addf %58, %60 : vector<1x1x128xf32>
    %62 = arith.negf %61 : vector<1x1x128xf32>
    %63 = math.exp %62 : vector<1x1x128xf32>
    %cst_23 = arith.constant 1.000000e+00 : f32
    %64 = vector.broadcast %cst_23 : f32 to vector<1x1x128xf32>
    %65 = arith.addf %64, %63 : vector<1x1x128xf32>
    %66 = arith.divf %64, %65 : vector<1x1x128xf32>
    %67 = vector.broadcast %66 : vector<1x1x128xf32> to vector<1x32x128xf32>
    %68 = arith.mulf %67, %1 : vector<1x32x128xf32>
    %69 = arith.truncf %68 : vector<1x32x128xf32> to vector<1x32x128xbf16>
    %c0_24 = arith.constant 0 : index
    %c0_25 = arith.constant 0 : index
    %c0_26 = arith.constant 0 : index
    %70 = vector.load %arg8[%c0_24, %c0_25, %c0_26] : memref<1x32x128xbf16, #tpu.memory_space<vmem>>, vector<1x32x128xbf16>
    tpu.vector_store %arg8[%c0_24, %c0_25, %c0_26], %69 {strides = array<i32>} : memref<1x32x128xbf16, #tpu.memory_space<vmem>>, vector<1x32x128xbf16>,
    %71 = arith.mulf %68, %1 : vector<1x32x128xf32>
    %cst_27 = arith.constant dense<0.000000e+00> : vector<1x32xf32>
    %72 = vector.multi_reduction <add>, %71, %cst_27 [2] : vector<1x32x128xf32> to vector<1x32xf32>
    %c0_28 = arith.constant 0 : index
    %c0_29 = arith.constant 0 : index
    %73 = vector.load %arg6[%c0_28, %c0_29] : memref<32x4xf32, #tpu.memory_space<vmem>>, vector<32x4xf32>
    %cst_30 = arith.constant dense<0.000000e+00> : vector<1x4xf32>
    %74 = tpu.matmul %72, %73, %cst_30 {dimension_numbers = #tpu.dot_dimension_numbers<[1], [0], [0], [1], [0, 0, 1, 1], [], []>} : vector<1x32xf32>, vector<32x4xf32>, vector<1x4xf32> -> vector<1x4xf32>
    %c0_31 = arith.constant 0 : index
    %c0_32 = arith.constant 0 : index
    %75 = vector.load %arg7[%c0_31, %c0_32] : memref<1x4xf32, #tpu.memory_space<vmem>>, vector<1x4xf32>
    %76 = arith.addf %74, %75 : vector<1x4xf32>
    %c0_33 = arith.constant 0 : index
    %c0_34 = arith.constant 0 : index
    %c0_35 = arith.constant 0 : index
    %77 = vector.load %arg9[%c0_33, %c0_34, %c0_35] : memref<1x1x4xf32, #tpu.memory_space<vmem>>, vector<1x1x4xf32>
    %78 = vector.shape_cast %77 : vector<1x1x4xf32> to vector<1x4xf32>
    %79 = vector.shape_cast %76 : vector<1x4xf32> to vector<1x1x4xf32>
    tpu.vector_store %arg9[%c0_33, %c0_34, %c0_35], %79 {strides = array<i32>} : memref<1x1x4xf32, #tpu.memory_space<vmem>>, vector<1x1x4xf32>,
    return
  }
  func.func @transform_0(%arg0: i32) -> (i32, i32, i32) {
    %c0_i32 = arith.constant 0 : i32
    %c0_i32_0 = arith.constant 0 : i32
    %c0_i32_1 = arith.constant 0 : i32
    return %arg0, %c0_i32, %c0_i32_0 : i32, i32, i32
  }
  func.func @transform_1(%arg0: i32) -> (i32, i32) {
    %c0_i32 = arith.constant 0 : i32
    %c0_i32_0 = arith.constant 0 : i32
    %c0_i32_1 = arith.constant 0 : i32
    return %c0_i32, %c0_i32_0 : i32, i32
  }
  func.func @transform_2(%arg0: i32) -> (i32, i32) {
    %c0_i32 = arith.constant 0 : i32
    %c0_i32_0 = arith.constant 0 : i32
    %c0_i32_1 = arith.constant 0 : i32
    return %c0_i32, %c0_i32_0 : i32, i32
  }
  func.func @transform_3(%arg0: i32) -> (i32, i32) {
    %c0_i32 = arith.constant 0 : i32
    %c0_i32_0 = arith.constant 0 : i32
    %c0_i32_1 = arith.constant 0 : i32
    return %c0_i32, %c0_i32_0 : i32, i32
  }
  func.func @transform_4(%arg0: i32) -> (i32, i32) {
    %c0_i32 = arith.constant 0 : i32
    %c0_i32_0 = arith.constant 0 : i32
    %c0_i32_1 = arith.constant 0 : i32
    return %c0_i32, %c0_i32_0 : i32, i32
  }
  func.func @transform_5(%arg0: i32) -> (i32, i32) {
    %c0_i32 = arith.constant 0 : i32
    %c0_i32_0 = arith.constant 0 : i32
    %c0_i32_1 = arith.constant 0 : i32
    return %c0_i32, %c0_i32_0 : i32, i32
  }
  func.func @transform_6(%arg0: i32) -> (i32, i32) {
    %c0_i32 = arith.constant 0 : i32
    %c0_i32_0 = arith.constant 0 : i32
    %c0_i32_1 = arith.constant 0 : i32
    return %c0_i32, %c0_i32_0 : i32, i32
  }
  func.func @transform_7(%arg0: i32) -> (i32, i32, i32) {
    %c0_i32 = arith.constant 0 : i32
    %c0_i32_0 = arith.constant 0 : i32
    %c0_i32_1 = arith.constant 0 : i32
    return %arg0, %c0_i32, %c0_i32_0 : i32, i32, i32
  }
  func.func @transform_8(%arg0: i32) -> (i32, i32, i32) {
    %c0_i32 = arith.constant 0 : i32
    %c0_i32_0 = arith.constant 0 : i32
    %c0_i32_1 = arith.constant 0 : i32
    return %arg0, %c0_i32, %c0_i32_0 : i32, i32, i32
  }
}

</mosaic_0001>

<bundles_post_ra>
// kernel: _lambda_.1
= control target key start
LH: loop header
LB: loop body
LE: loop exit
PB: predicated region body
PF: predicated region fallthrough
CT: control target
= control target key end

     0   :  { %14 = vsyncpa [#allocation3], 0  ;;  %s1878_s0 = inlined_call_operand.vmem [shape: bf16[2,32,128], index: 0, kind: input, shape index: {}]   ;;  %s1879_s1 = inlined_call_operand.hbm [shape: bf16[12,32], index: 1, kind: input, shape index: {}]   ;;  %s1880_s2 = inlined_call_operand.vmem [shape: bf16[256,16], index: 2, kind: input, shape index: {}]   ;;  %s1881_s3 = inlined_call_operand.vmem [shape: bf16[3,16], index: 3, kind: input, shape index: {}]   ;;  %s1882_s4 = inlined_call_operand.vmem [shape: f32[33,1], index: 4, kind: input, shape index: {}]   ;;  %s1883_s5 = inlined_call_operand.hbm [shape: f32[32,4], index: 5, kind: input, shape index: {}]   ;;  %s1884_s6 = inlined_call_operand.vmem [shape: f32[1,4], index: 6, kind: input, shape index: {}]   ;;  %s1885_s7 = inlined_call_operand.vmem [shape: bf16[2,32,128], index: 7, kind: output, shape index: {0}]   ;;  %s1886_s8 = inlined_call_operand.hbm [shape: f32[2,1,4], index: 8, kind: output, shape index: {1}]  }
   0x1   :  { %15 = vsyncpa [#allocation6], 0 }
   0x2   :  { %16 = vsyncpa [#allocation4], 0 }
   0x3   :  { %18 = vsyncpa [#allocation4 + $0x1], 0  ;;  %s1616_s27 = smov 0   ;;  %s1618_s28 = smov 0  }
   0x4   :  { %s1620_s29 = smov 0   ;;  %s1622_s30 = smov 0  }
   0x5 LB: > { %s1637_s9 = sadd.s32 4294967295, %s1559_s30   ;;  %s1207_s10 = sadd.s32 4294967294, %s1559_s30   ;;  %s1559_s30 = sphi %s1622_s30, %s1900_s30   ;;  %s1555_s29 = sphi %s1620_s29, %s1899_s29   ;;  %s1551_s28 = sphi %s1618_s28, %s1898_s28   ;;  %s1547_s27 = sphi %s1616_s27, %s1897_s27  }
   0x6   : > { %s1641_s11 = sadd.s32 1, %s1559_s30   ;;  %s209_s12 = sadd.s32 1, %s1555_s29 }
   0x7   : > { %s206_s13 = ssub.s32 %s1559_s30, %s1641_s11  ;;  %p219_p0 = scmp.ne.s32.totalorder %s1555_s29, %s1551_s28 }
   0x8   : > { %p207_p1 = scmp.eq.s32.totalorder %s206_s13, 0  ;;  %p220_p2 = scmp.eq.s32.totalorder %s1637_s9, 1 }
   0x9   : > { %p225_p3 = scmp.ne.s32.totalorder %s1551_s28, %s1547_s27  ;;  %p226_p4 = scmp.eq.s32.totalorder %s1207_s10, 1 }
   0xa   : > { %s1652_s14 = scalar_select %p207_p1, %s1555_s29, %s209_s12  }
   0xb   : > { %p1654_p5 = por %p220_p2, %p219_p0  ;;  %p1658_p6 = por %p226_p4, %p225_p3 }
   0xc   : > { %p1208_p7 = scmp.ge.s32.totalorder %s1559_s30, 1  ;;  %p233_p8 = scmp.lt.s32.totalorder %s1559_s30, 3 }
   0xd   : > { %s1889_s16 = scalar_select %p1658_p6, 1, 0 }
   0xe   : > { %p1887_p9 = scmp.eq.s32.totalorder %s1637_s9, 0  ;;  %p1665_p10 = pnand %p1208_p7, %p233_p8 }
   0xf   : > { %s1561_s18 = smov [#allocation2]   ;;  %s1562_s21 = smov [#allocation5]  }
  0x10   : > { %s245_s19 = sshll.u32 %s1561_s18, 4  ;;  %p1355_p11 = pneg %p1665_p10  ;;  %s246_s19 = int_to_ptr.vmem [resolvable:$true] %s245_s19 }
  0x11   : > { %s267_s22 = sshll.u32 %s1562_s21, 4  ;;  %s1450_s23 = scalar_lea.vmem %s246_s19, 128  ;;  %s268_s22 = int_to_ptr.vmem [resolvable:$true] %s267_s22 }
  0x12   : > { %p1673_p12 = pnand %p1887_p9, %p1355_p11  ;;  %p1451_p0 = scmp.ne.s32.totalorder %s246_s19, %s1450_s23 }
  0x13   : > { %p1458_p3 = scmp.lt.s32.totalorder %s246_s19, %s246_s19  ;;  %p1459_p4 = scmp.lt.s32.totalorder %s1450_s23, %s1450_s23 }
  0x14   : > { %p1441_p13 = pneg %p1673_p12 }
  0x15   : > { %p1460_p7 = por %p1459_p4, %p1458_p3 }
  0x16   : > { %p1453_p1 = pnand %p1451_p0, %p1441_p13 }
  0x18   : > { %p1454_p2 = pneg %p1453_p1 }
  0x1a   : > { %p1461_p8 = pnand %p1460_p7, %p1454_p2 }
  0x1c   : > { %1464 = shalt.err (!%p1461_p8)
}
  0x1d   : > { %s1563_s24 = smov 64   ;;  %s1564_s25 = smov 4  }
  0x1e   : > { %1358 = dma.hbm_to_vmem [thread:$0]  (!%p1673_p12), %s1879_s1, 128, %s246_s19, [#allocation3], %s1563_s24, %s1563_s24, %s1564_s25  }
  0x1f   : > { %s1476_s12 = scalar_lea.vmem %s268_s22, 512  ;;  %p1484_p9 = scmp.lt.s32.totalorder %s268_s22, %s268_s22 }
  0x20   : > { %p1477_p11 = scmp.ne.s32.totalorder %s268_s22, %s1476_s12  ;;  %p1485_p6 = scmp.lt.s32.totalorder %s1476_s12, %s1476_s12 }
  0x22   : > { %p1479_p0 = pnand %p1477_p11, %p1441_p13  ;;  %p1486_p3 = por %p1485_p6, %p1484_p9 }
  0x24   : > { %p1480_p1 = pneg %p1479_p0 }
  0x26   : > { %p1487_p2 = pnand %p1486_p3, %p1480_p1 }
  0x28   : > { %1490 = shalt.err (!%p1487_p2)
}
  0x29   : > { %s1565_s13 = smov 128   ;;  %s1566_s18 = smov 8  }
  0x2a   : > { %1361 = dma.hbm_to_vmem [thread:$0]  (!%p1673_p12), %s1883_s5, 512, %s268_s22, [#allocation6], %s1565_s13, %s1565_s13, %s1566_s18  }
  0x2b   : > { %294 = sbr.rel (%p1665_p10) target bundleno = 1476 (0x5c4), region = 48  ;;  %p1892_p4 = scmp.eq.s32.totalorder (!%p1665_p10), %s1637_s9, 0 }
  0x30   : > { %1534 = dma.done.wait (%p1892_p4), [#allocation3], 128   ;;  %p1893_p13 = pmov %p1892_p4 }
  0x31   : > { %p1894_p6 = pmov %p1892_p4 }
  0x32   : > { %1536 = vsyncadd (%p1893_p13), [#allocation3], 4294967168 }
  0x33   : > { %1538 = dma.done.wait (%p1894_p6), [#allocation6], 512   ;;  %p1895_p9 = pmov %p1892_p4 }
  0x34   : > { %p336_p7 = scmp.lt.s32.totalorder %s1637_s9, 1  ;;  %v1567_v0 = vmov 0.0   ;;  %vm1568_vm0 = vmmov 0   ;;  %v1569_v1 = vmov 0   ;;  %v1417_v4 = vld [vmem:[%s1880_s2 + $0x40] sm:$0xff]   ;;  %v1418_v5 = vld [vmem:[%s1880_s2 + $0x48] sm:$0xff]  }
  0x35   : > { %1540 = vsyncadd (%p1895_p9), [#allocation6], 4294966784  ;;  %1290 = vmatprep.subr.bf16.mxu0 %v1567_v0  ;;  %1294 = vmatprep.mubr.msk.bf16.mxu0 %vm1568_vm0, %v1567_v0  ;;  %v1416_v6 = vld [vmem:[#allocation2] sm:$0x3f]   ;;  %vm423_vm1 = vcmask 261120   ;;  %v1419_v7 = vld [vmem:[%s1880_s2 + $0x50] sm:$0xff]  }
  0x36   : > { %s1710_s17 = scalar_select %p336_p7, %s1637_s9, 1  ;;  %1412 = vset.pattern.permute.xlu0 %v1569_v1  ;;  %1298 = vmatprep.subr.bf16.mxu1 %v1567_v0  ;;  %v391_v8 = vld [vmem:[%s1882_s4] sm:$0xff]  ;;  %v1420_v9 = vld [vmem:[%s1880_s2 + $0x58] sm:$0xff]   ;;  %v1422_v11 = vld [vmem:[%s1880_s2 + $0x68] sm:$0xff]   ;;  %vm690_vm2 = vcmask 1041408   ;;  %vm686_vm3 = vcmask 31744  }
  0x37   : > { %1300 = vmatprep.mubr.msk.bf16.mxu1 %vm1568_vm0, %v1567_v0  ;;  %627 = vxpose.xlu1.c.b16.start [1/8] (narrow) %v1417_v4, 16  ;;  %v1421_v10 = vld [vmem:[%s1880_s2 + $0x60] sm:$0xff]   ;;  %v1423_v12 = vld [vmem:[%s1880_s2 + $0x70] sm:$0xff]   ;;  %v1424_v13 = vld [vmem:[%s1880_s2 + $0x78] sm:$0xff]   ;;  %vm790_vm4 = vcmask 1043456   ;;  %vm817_vm5 = vcmask 130048  }
  0x38   : > { %s1253_s19 = sshll.u32 %s1710_s17, 4  ;;  %398 = vperm.xlu0 %1412, %v391_v8   ;;  %v392_v14 = vld [vmem:[%s1882_s4 + $0x8] sm:$0xff]  ;;  %v1425_v15 = vld [vmem:[%s1880_s2] sm:$0xff]   ;;  %v393_v16 = vld [vmem:[%s1882_s4 + $0x10] sm:$0xff]  ;;  %vm884_vm6 = vcmask 1040384   ;;  %vm880_vm7 = vcmask 15360  }
  0x39   : > { %s340_s24 = scalar_lea.vmem %s1878_s0, %s1253_s19  ;;  %v1426_v17 = vld [vmem:[%s1880_s2 + $0x8] sm:$0xff]   ;;  %v394_v18 = vld [vmem:[%s1882_s4 + $0x18] sm:$0xff]  ;;  %v1427_v19 = vld [vmem:[%s1880_s2 + $0x10] sm:$0xff]   ;;  %s345_s13 = scalar_lea.vmem %s1885_s7, %s1253_s19  ;;  %vm994_vm8 = vcmask 130112   ;;  %vm1001_vm9 = vcmask 195712   ;;  %vm1008_vm10 = vcmask 261312  }
  0x3a   : > { %v1721_v2 = vld [vmem:[%s340_s24 + $0x8] sm:$0xff]   ;;  %v1723_v3 = vld [vmem:[%s340_s24] sm:$0xff]   ;;  %v1428_v20 = vld [vmem:[%s1880_s2 + $0x18] sm:$0xff]   ;;  %s334_s17 = sand.u32 1, %s1551_s28   ;;  %s1250_s21 = sshll.u32 %s1637_s9, 4  ;;  %vm1082_vm11 = vcmask 24576  }
  0x3b   : > { %1291 = vmatpush3.bf16.msra.mxu0 %v1721_v2  ;;  %628 = vxpose.xlu1.c.b16.cont [2/8] (narrow) %v1418_v5, 16  ;;  %v1429_v21 = vld [vmem:[%s1880_s2 + $0x20] sm:$0xff]   ;;  %v1430_v22 = vld [vmem:[%s1880_s2 + $0x28] sm:$0xff]   ;;  %v1431_v23 = vld [vmem:[%s1880_s2 + $0x30] sm:$0xff]   ;;  %s335_s23 = scalar_lea.vmem [#allocation7], %s334_s17  ;;  %s1843_s25 = scalar_lea.hbm %s1886_s8, %s1250_s21 }
  0x3c   : > { %1292 = vmatprep.subr.bf16.mxu0 %v1567_v0  ;;  %v1432_v24 = vld [vmem:[%s1880_s2 + $0x38] sm:$0xff]   ;;  %v395_v40 = vld [vmem:[%s1882_s4 + $0x20] sm:$0x1]  ;;  %s1105_s20 = sshll.u32 %s335_s23, 4  ;;  %s1090_s26 = scalar_lea.sflag [#allocation4], %s334_s17  ;;  %s1106_s20 = int_to_ptr.vmem [resolvable:$true] %s1105_s20 }
  0x3d   : > { %s1491_s10 = scalar_lea.vmem %s1106_s20, 16  ;;  %s1570_s9 = smov [#allocation7]  }
  0x3e   : > { %p1492_p10 = scmp.ne.s32.totalorder %s1106_s20, %s1491_s10  ;;  %s1495_s12 = sshll.u32 %s1570_s9, 4  ;;  %s1496_s12 = int_to_ptr.vmem [resolvable:$false] %s1495_s12 }
  0x3f   : > { %1293 = vmatpush3.bf16.msra.mxu0 %v1723_v3  ;;  %629 = vxpose.xlu1.c.b16.cont [3/8] (narrow) %v1419_v7, 16  ;;  %p1498_p11 = scmp.lt.s32.totalorder %s1106_s20, %s1496_s12 }
  0x40   : > { %1304 = vmatprep.subr.bf16.mxu0 %v1567_v0  ;;  %p1493_p12 = pnand %p1492_p10, %p1654_p5 }
  0x42   : > { %1295 = vmatmul.mubr.msk.bf16.vlgmr.msra.gmra.mxu0 %vm423_vm1, %v1416_v6  ;;  %p1494_p8 = pneg %p1493_p12 }
  0x43   : > { %1306 = vmatprep.mubr.msk.bf16.mxu0 %vm1568_vm0, %v1567_v0  ;;  %630 = vxpose.xlu1.c.b16.cont [4/8] (narrow) %v1420_v9, 16 }
  0x47   : > { %631 = vxpose.xlu1.c.b16.cont [5/8] (narrow) %v1421_v10, 16 }
  0x4b   : > { %632 = vxpose.xlu1.c.b16.cont [6/8] (narrow) %v1422_v11, 16 }
  0x4f   : > { %633 = vxpose.xlu1.c.b16.cont [7/8] (narrow) %v1423_v12, 16  ;;  %v389_v12 = vld [vmem:[%s1881_s3] sm:$0x1] }
  0x53   : > { %634 = vxpose.xlu1.c.b16.end [8/8] (narrow) %v1424_v13, 16 }
  0x56   : > { %519 = vxpose.xlu0.c.b16.start [1/8] (narrow) %v1425_v15, 16 }
  0x57   : > { %1413 = vset.pattern.permute.xlu1 %v1569_v1 }
  0x58   : > { %403 = vperm.xlu1 %1413, %v392_v14  }
  0x5a   : > { %520 = vxpose.xlu0.c.b16.cont [2/8] (narrow) %v1426_v17, 16 }
  0x5c   : > { %784 = vperm.xlu1 %1413, %v393_v16  }
  0x5e   : > { %521 = vxpose.xlu0.c.b16.cont [3/8] (narrow) %v1427_v19, 16 }
  0x60   : > { %788 = vperm.xlu1 %1413, %v394_v18  }
  0x62   : > { %522 = vxpose.xlu0.c.b16.cont [4/8] (narrow) %v1428_v20, 16 }
  0x64   : > { %868 = vperm.xlu1 %1413, %v395_v40  }
  0x66   : > { %523 = vxpose.xlu0.c.b16.cont [5/8] (narrow) %v1429_v21, 16 }
  0x6a   : > { %524 = vxpose.xlu0.c.b16.cont [6/8] (narrow) %v1430_v22, 16 }
  0x6e   : > { %525 = vxpose.xlu0.c.b16.cont [7/8] (narrow) %v1431_v23, 16 }
  0x72   : > { %526 = vxpose.xlu0.c.b16.end [8/8] (narrow) %v1432_v24, 16 }
  0x99   : > { %v635_v25 = vpop.trf.xlu1 }
  0xb3   : > { %v399_v26 = vpop.permute.xlu0 %398 }
  0xb8   : > { %v527_v37 = vpop.trf.xlu0 }
  0xd3   : > { %v404_v30 = vpop.permute.xlu1 %403 }
  0xd4   : > { %v791_v53 = vrot.slane %v404_v30, 4 }
  0xd7   : > { %v785_v51 = vpop.permute.xlu1 %784 }
  0xd8   : > { %v792_v54 = vrot.slane %v785_v51, 4  ;;  %v354_v51 = vunpack.c.h.bf16 %v1721_v2 }
  0xda   : > { %v793_v62 = vsel %vm790_vm4, %v791_v53, %v792_v54 }
  0xdb   : > { %v789_v57 = vpop.permute.xlu1 %788 }
  0xdc   : > { %v794_v59 = vrot.slane %v789_v57, 4 }
  0xde   : > { %v795_v6 = vsel %vm790_vm4, %v792_v54, %v794_v59 }
 0x102   : > { %v461_v27 = vpop.f32.mrf.mxu0 }
 0x103   : > { %v462_v28 = vadd.f32 %v461_v27, %v399_v26 }
 0x104   : > { %v1296_v29 = vpop.f32.mrf.mxu0 }
 0x105   : > { %v468_v31 = vmax.f32 %v462_v28, 0.0 }
 0x106   : > { %v464_v32 = vpop.f32.mrf.mxu0 }
 0x107   : > { %v470_v33 = vpack.c.bf16 %v468_v31, %v468_v31  ;;  %v1792_v34 = vadd.f32 %v464_v32, %v404_v30  ;;  %v1242_v32 = vld.sshfl [vmem:[%s1881_s3] sm:$0x2 pattern:$0x76325410] }
 0x108   : > { %v1297_v35 = vpop.f32.mrf.mxu0 }
 0x109   : > { %1305 = vmatpush3.bf16.xpose.msra.mxu0 %v470_v33  ;;  %v536_v36 = vrot.slane %v470_v33, 2  ;;  %v739_v38 = vsel %vm690_vm2, %v470_v33, 0  ;;  %v469_v13 = vmax.f32 %v1792_v34, 0.0  ;;  %v879_v35 = vrot.slane %v1242_v32, 1 }
 0x10a   : > { %1316 = vmatprep.subr.bf16.mxu0 %v1567_v0 }
 0x10b   : > { %1299 = vmatpush3.bf16.xpose.msra.mxu1 %v536_v36  ;;  %v692_v39 = vsel %vm690_vm2, %v536_v36, 0  ;;  %v802_v14 = vsel %vm790_vm4, %v469_v13, 0.0  ;;  %v869_v36 = vpop.permute.xlu1 %868 }
 0x10c   : > { %1310 = vmatprep.subr.bf16.mxu1 %v1567_v0  ;;  %v803_v15 = vrot.slane %v802_v14, 4 }
 0x10e   : > { %v804_v16 = vadd.f32 %v803_v15, %v802_v14 }
 0x110   : > { %1307 = vmatmul.mubr.bf16.vlgmr.msra.gmra.mxu0 %v635_v25  ;;  %v805_v17 = vrot.slane %v804_v16, 2  ;;  %v861_v25 = vrot.slane %v789_v57, 6 }
 0x111   : > { %1317 = vmatpush3.bf16.msra.mxu0 %v739_v38  ;;  %1318 = vmatprep.mubr.msk.bf16.mxu0 %vm1568_vm0, %v1567_v0 }
 0x112   : > { %1301 = vmatmul.mubr.bf16.vlgmr.msra.gmra.mxu1 %v527_v37  ;;  %1328 = vmatprep.subr.bf16.mxu0 %v1567_v0  ;;  %v806_v18 = vadd.f32 %v805_v17, %v804_v16 }
 0x113   : > { %1311 = vmatpush3.bf16.msra.mxu1 %v692_v39  ;;  %1312 = vmatprep.mubr.msk.bf16.mxu1 %vm1568_vm0, %v1567_v0 }
 0x114   : > { %1322 = vmatprep.subr.bf16.mxu1 %v1567_v0  ;;  %v807_v19 = vrot.slane %v806_v18, 1 }
 0x116   : > { %v808_v20 = vadd.f32 %v807_v19, %v806_v18 }
 0x118   : > { %v810_v21 = vmul.f32 0.25, %v808_v20 }
 0x11a   : > { %v813_v22 = vmul.f32 %v810_v21, %v789_v57 }
 0x11c   : > { %v815_v23 = vrot.slane %v813_v22, 4 }
 0x1d0   : > { %v677_v41 = vpop.f32.mrf.mxu0 }
 0x1d2   : > { %v572_v42 = vpop.f32.mrf.mxu1  ;;  %v1308_v43 = vpop.f32.mrf.mxu0 }
 0x1d4   : > { %v1302_v44 = vpop.f32.mrf.mxu1  ;;  %v680_v45 = vpop.f32.mrf.mxu0 }
 0x1d5   : > { %v685_v46 = vpack.c.bf16 %v680_v45, %v677_v41  ;;  %v934_v45 = vlaneseq }
 0x1d6   : > { %v575_v47 = vpop.f32.mrf.mxu1  ;;  %v1309_v48 = vpop.f32.mrf.mxu0 }
 0x1d7   : > { %v684_v49 = vpack.c.bf16 %v575_v47, %v572_v42  ;;  %1313 = vmatmul.mubr.msk.bf16.vlgmr.msra.gmra.mxu1 %vm686_vm3, %v685_v46  ;;  %v935_v46 = vshrl.u32 %v934_v45, 7  ;;  %v352_v48 = vunpack.c.h.bf16 %v1723_v3 }
 0x1d8   : > { %v1303_v50 = vpop.f32.mrf.mxu1  ;;  %1324 = vmatprep.mubr.msk.bf16.mxu1 %vm1568_vm0, %v1567_v0 }
 0x1d9   : > { %1319 = vmatmul.mubr.msk.bf16.vlgmr.msra.gmra.mxu0 %vm686_vm3, %v684_v49  ;;  %v936_v47 = vsub.s32 0, %v935_v46  ;;  %v351_v49 = vunpack.c.l.bf16 %v1723_v3  ;;  %v353_v50 = vunpack.c.l.bf16 %v1721_v2 }
 0x1da   : > { %1330 = vmatprep.mubr.msk.bf16.mxu0 %vm1568_vm0, %v1567_v0 }
 0x297   : > { %v728_v52 = vpop.f32.mrf.mxu1 }
 0x299   : > { %v1314_v55 = vpop.f32.mrf.mxu1  ;;  %v775_v56 = vpop.f32.mrf.mxu0 }
 0x29a   : > { %v776_v58 = vadd.f32 %v775_v56, %v728_v52 }
 0x29b   : > { %v731_v60 = vpop.f32.mrf.mxu1  ;;  %v1320_v61 = vpop.f32.mrf.mxu0 }
 0x29c   : > { %v798_v4 = vadd.f32 %v793_v62, %v776_v58  ;;  %v977_v62 = vld [vmem:[#allocation5 + $0x18] sm:$0xff] }
 0x29d   : > { %v1315_v63 = vpop.f32.mrf.mxu1  ;;  %v778_v1 = vpop.f32.mrf.mxu0 }
 0x29e   : > { %v779_v5 = vadd.f32 %v778_v1, %v731_v60  ;;  %v800_v9 = vmax.f32 %v798_v4, 0.0  ;;  %v976_v63 = vld [vmem:[#allocation5 + $0x10] sm:$0xff]  ;;  %v975_v1 = vld [vmem:[#allocation5 + $0x8] sm:$0xff]  ;;  %v974_v4 = vld [vmem:[#allocation5] sm:$0xff] }
 0x29f   : > { %v1321_v7 = vpop.f32.mrf.mxu0 }
 0x2a0   : > { %v799_v8 = vadd.f32 %v795_v6, %v779_v5  ;;  %v984_v5 = vand.u32 127, %v934_v45 }
 0x2a2   : > { %v801_v10 = vmax.f32 %v799_v8, 0.0  ;;  %v989_v6 = vadd.s32 4294967288, %v984_v5  ;;  %v996_v7 = vadd.s32 4294967280, %v984_v5 }
 0x2a4   : > { %v811_v11 = vpack.c.bf16 %v801_v10, %v800_v9  ;;  %v992_v9 = vsub.s32 %v989_v6, %v935_v46  ;;  %v987_v10 = vsub.s32 %v984_v5, %v935_v46  ;;  %v999_v13 = vsub.s32 %v996_v7, %v935_v46 }
 0x2a6   : > { %1323 = vmatpush3.bf16.msra.mxu1 %v811_v11  ;;  %v1003_v11 = vadd.s32 4294967272, %v984_v5 }
 0x2a7   : > { %1334 = vmatprep.subr.mxu1 %v1567_v0 }
 0x2a8   : > { %v1006_v17 = vsub.s32 %v1003_v11, %v935_v46 }
 0x2a9   : > { %1325 = vmatmul.mubr.msk.bf16.vlgmr.msra.gmra.mxu1 %vm817_vm5, %v389_v12 }
 0x2aa   : > { %1342 = vmatprep.mubr.msk.f32.mxu1 %vm1568_vm0, %v1567_v0  ;;  %1335 = vmatpush3.msra.mxu1 %v977_v62 }
 0x2ab   : > { %1336 = vmatprep.subr.mxu1 %v1567_v0 }
 0x2ac   : > { %1337 = vmatpush3.msra.mxu1 %v976_v63 }
 0x2ad   : > { %1338 = vmatprep.subr.mxu1 %v1567_v0 }
 0x2ae   : > { %1339 = vmatpush3.msra.mxu1 %v975_v1 }
 0x2af   : > { %1340 = vmatprep.subr.mxu1 %v1567_v0 }
 0x2b0   : > { %1341 = vmatpush3.msra.mxu1 %v974_v4 }
 0x369   : > { %v855_v24 = vpop.f32.mrf.mxu1 }
 0x36a   : > { %v856_v26 = vadd.f32 %v855_v24, %v815_v23  ;;  %v978_v23 = vld [vmem:[%s1884_s6] sm:$0x1] }
 0x36b   : > { %v1326_v27 = vpop.f32.mrf.mxu1 }
 0x36c   : > { %v863_v28 = vadd.f32 %v861_v25, %v856_v26 }
 0x36d   : > { %v858_v29 = vpop.f32.mrf.mxu1 }
 0x36e   : > { %v864_v30 = vmax.f32 %v863_v28, 0.0 }
 0x36f   : > { %v1327_v31 = vpop.f32.mrf.mxu1 }
 0x370   : > { %v865_v33 = vpack.c.bf16 %v864_v30, %v864_v30 }
 0x372   : > { %v886_v34 = vsel %vm884_vm6, %v865_v33, 0 }
 0x373   : > { %1329 = vmatpush3.bf16.msra.mxu0 %v886_v34 }
 0x376   : > { %1331 = vmatmul.mubr.msk.bf16.vlgmr.msra.gmra.mxu0 %vm880_vm7, %v879_v35 }
 0x436   : > { %v922_v37 = vpop.f32.mrf.mxu0 }
 0x437   : > { %v923_v38 = vadd.f32 %v922_v37, %v869_v36 }
 0x438   : > { %v1332_v39 = vpop.f32.mrf.mxu0 }
 0x439   : > { %v1244_v40 = vmul.f32 -1.442695, %v923_v38 }
 0x43a   : > { %v925_v41 = vpop.f32.mrf.mxu0 }
 0x43b   : > { %1435 = vpow2.f32 %v1244_v40 }
 0x43c   : > { %v1333_v42 = vpop.f32.mrf.mxu0 }
 0x448   : > { %v1436_v43 = vpop.eup %1435 }
 0x449   : > { %v931_v44 = vadd.f32 1.0, %v1436_v43 }
 0x44b   : > { %1437 = vrcp.f32 %v931_v44 }
 0x458   : > { %v1438_v52 = vpop.eup %1437 }
 0x459   : > { %v937_v53 = vrot.slane %v1438_v52, %v936_v47 }
 0x45b   : > { %v939_v54 = vmul.f32 %v937_v53, %v352_v48  ;;  %v938_v55 = vmul.f32 %v937_v53, %v351_v49  ;;  %v940_v56 = vmul.f32 %v937_v53, %v353_v50  ;;  %v941_v57 = vmul.f32 %v937_v53, %v354_v51 }
 0x45d   : > { %v963_v58 = vmul.f32 %v939_v54, %v352_v48  ;;  %v962_v59 = vmul.f32 %v938_v55, %v351_v49  ;;  %v1262_v60 = vpack.c.bf16 %v939_v54, %v938_v55  ;;  %v1267_v61 = vpack.c.bf16 %v941_v57, %v940_v56 }
 0x45e   : > { %v964_v2 = vmul.f32 %v940_v56, %v353_v50  ;;  %v965_v3 = vmul.f32 %v941_v57, %v354_v51 }
 0x45f   : > { %968 = vadd.xlane.f32.xlu0 %v963_v58  ;;  %966 = vadd.xlane.f32.xlu1 %v962_v59  ;;  %1263 = vst [vmem:[%s345_s13] sm:$0xff] %v1262_v60   ;;  %1269 = vst [vmem:[%s345_s13 + $0x8] sm:$0xff] %v1267_v61   ;;  %s1497_s13 = scalar_lea.vmem %s1496_s12, 32 }
 0x460   : > { %p1499_p0 = scmp.lt.s32.totalorder %s1497_s13, %s1491_s10 }
 0x462   : > { %p1500_p1 = por %p1499_p0, %p1498_p11 }
 0x463   : > { %970 = vadd.xlane.f32.xlu0 %v964_v2 }
 0x464   : > { %p1501_p3 = pnand %p1500_p1, %p1494_p8 }
 0x467   : > { %972 = vadd.xlane.f32.xlu0 %v965_v3 }
 0x4e8   : > { %v969_v8 = vpop.xlane.xlu0 %968  ;;  %v967_v12 = vpop.xlane.xlu1 %966 }
 0x4e9   : > { %v993_v15 = vrot.slane %v969_v8, %v992_v9  ;;  %v988_v16 = vrot.slane %v967_v12, %v987_v10 }
 0x4eb   : > { %v995_v19 = vsel %vm994_vm8, %v993_v15, %v988_v16 }
 0x4ec   : > { %v971_v14 = vpop.xlane.xlu0 %970 }
 0x4ed   : > { %v1000_v18 = vrot.slane %v971_v14, %v999_v13 }
 0x4ef   : > { %v1002_v21 = vsel %vm1001_vm9, %v1000_v18, %v995_v19 }
 0x4f0   : > { %v973_v0 = vpop.xlane.xlu0 %972 }
 0x4f1   : > { %v1007_v20 = vrot.slane %v973_v0, %v1006_v17 }
 0x4f3   : > { %v1009_v22 = vsel %vm1008_vm10, %v1007_v20, %v1002_v21 }
 0x4f4   : > { %1343 = vmatmul.mubr.msk.f32.vlgmr.msra.gmra.mxu1 %vm423_vm1, %v1009_v22 }
 0x5b4   : > { %v1078_v24 = vpop.f32.mrf.mxu1 }
 0x5b5   : > { %v1079_v25 = vadd.f32 %v1078_v24, %v978_v23 }
 0x5b6   : > { %v1344_v26 = vpop.f32.mrf.mxu1 }
 0x5b7   : > { %1083 = vst.msk [vmem:[%s335_s23] sm:$0x1] %vm1082_vm11, %v1079_v25 }
 0x5b8   : > { %1504 = shalt.err (!%p1501_p3)
}
 0x5b9   : > { %s1505_s19 = scalar_lea.hbm %s1843_s25, 16  ;;  %s1509_s21 = scalar_lea.hbm %s1886_s8, 32 }
 0x5ba   : > { %p1506_p2 = scmp.ne.s32.totalorder %s1843_s25, %s1505_s19  ;;  %p1510_p6 = scmp.lt.s32.totalorder %s1843_s25, %s1886_s8 }
 0x5bb   : > { %p1511_p9 = scmp.lt.s32.totalorder %s1509_s21, %s1505_s19 }
 0x5bc   : > { %p1507_p4 = pnand %p1506_p2, %p1654_p5 }
 0x5bd   : > { %p1512_p7 = por %p1511_p9, %p1510_p6 }
 0x5be   : > { %p1508_p13 = pneg %p1507_p4 }
 0x5c0   : > { %p1513_p10 = pnand %p1512_p7, %p1508_p13 }
 0x5c2   : > { %1516 = shalt.err (!%p1513_p10)
}
 0x5c3   : > { %1353 = dma.vmem_to_hbm [thread:$0]  (%p1654_p5), %s1106_s20, 16, %s1843_s25, %s1090_s26  }
 0x5c4 PF: > { %p1370_p12 = scmp.ge.s32.totalorder %s1559_s30, 2  ;;  %s1125_s24 = sand.u32 1, %s1547_s27  }
 0x5c5   : > { %p1896_p8 = scmp.ne.s32.totalorder %s1889_s16, 0  ;;  %s1126_s10 = scalar_lea.sflag [#allocation4], %s1125_s24 }
 0x5c7   : > { %p1363_p11 = pnand %p1370_p12, %p1896_p8 }
 0x5c9   : > { %p1364_p0 = pneg %p1363_p11 }
 0x5cb   : > { %1542 = dma.done.wait (%p1364_p0), %s1126_s10, 16  }
 0x5cc   : > { %1544 = vsyncadd (%p1364_p0), %s1126_s10, 4294967280  ;;  %p21_p1 = scmp.ge.s32.totalorder %s1641_s11, 4   ;;  %s1897_s27 = smov %s1551_s28 }
 0x5cd   : > { %s1898_s28 = smov %s1555_s29  ;;  %s1899_s29 = smov %s1652_s14 }
 0x5ce   : > { %s1900_s30 = smov %s1641_s11  ;;  %23 = sbr.rel (!%p21_p1) target bundleno = 5 (0x5), region = 104 }
 0x5d3   :  { %1130 = vsyncpa [#allocation3], 1 }
 0x5d4   :  { %1132 = vsyncpa [#allocation3 + $0x1], 1 }
 0x5d5   :  { %1133 = vsyncpa [#allocation6], 1 }
 0x5d6   :  { %1134 = vsyncpa [#allocation4], 1 }
 0x5d7   :  { %1136 = vsyncpa [#allocation4 + $0x1], 1 }

</bundles_post_ra>
